<compile_context>
chip_gen: v5e
topology: v5e:2x2
jax: 0.10.0
libtpu: 0.0.40
codegen_flags: <defaults>
</compile_context>

<pallas_src>
import functools

import jax
import jax.numpy as jnp
from jax.experimental import pallas as pl
from jax.experimental.pallas import tpu as pltpu


_SUBLANE = 16  # covers bf16 sublane packing (16) and is a multiple of 8 for f32


def _round_up(x, m):
    return (x + m - 1) // m * m


def _vmem_capacity_bytes():
    """Physical VMEM per TensorCore; conservative fallback if the query fails."""
    try:
        info = pltpu.get_tpu_info()
        cap = getattr(info, "vmem_capacity_bytes", None)
        if cap:
            return int(cap)
    except Exception:
        pass
    return 64 * 1024 * 1024  # v7x-sized fallback (safe lower bound for all gens)


def _select_tile_m(tokens, H, act_bytes, mxu_bytes, vmem_budget, tile_m_req):
    """Pick the largest sublane-aligned token tile that fits the VMEM budget."""
    tile_m = max(_SUBLANE, min(int(tile_m_req), _round_up(tokens, _SUBLANE)))
    tile_m = _round_up(tile_m, _SUBLANE)

    def vmem_est(tm):
        return (H * H * mxu_bytes            # resident weight
                + 2 * tm * H * mxu_bytes     # double-buffered hidden_states tiles
                + 2 * tm * H * act_bytes     # double-buffered residual tiles
                + 2 * tm * H * act_bytes     # double-buffered output tiles
                + 4 * tm * H * 4             # live f32 temporaries in matmul/LN tail
                + 3 * 2 * H * 4)             # bias / gamma / beta

    while tile_m > _SUBLANE and vmem_est(tile_m) > vmem_budget:
        tile_m = _round_up(tile_m // 2, _SUBLANE)

    # v7x has two TensorCores sharing the grid through the "parallel" axis; keep at
    # least two grid steps when there is enough work to split (no-op for tiny inputs).
    if pl.cdiv(tokens, tile_m) == 1 and tokens > _SUBLANE:
        tile_m = min(tile_m, _round_up(pl.cdiv(tokens, 2), _SUBLANE))

    return tile_m, vmem_est(tile_m)


def _self_output_kernel(x_ref, res_ref, w_ref, b_ref, g_ref, beta_ref, o_ref, *, eps):
    # x_ref:   (TM, H)  hidden_states tile (MXU dtype, e.g. bf16)
    # res_ref: (TM, H)  residual (input_tensor) tile (activation dtype)
    # w_ref:   (H, H)   dense weight, transposed to (in, out), VMEM-resident
    # b_ref:   (1, H)   dense bias       (VMEM-resident)
    # g_ref:   (1, H)   LayerNorm gamma  (VMEM-resident)
    # beta_ref:(1, H)   LayerNorm beta   (VMEM-resident)

    # MXU matmul in stored dtype, f32 accumulation.
    h = jnp.dot(x_ref[...], w_ref[...], preferred_element_type=jnp.float32)

    # TODO(synk): dropout is identity in eval/inference; training-mode dropout would
    # use pltpu.prng_seed / pltpu.prng_random_bits.

    # Residual add + LayerNorm over the hidden (lane) dim, all in f32.
    # Single-pass statistics (var = E[y^2] - mean^2) to keep fewer live f32 tiles.
    y = h + b_ref[...].astype(jnp.float32) + res_ref[...].astype(jnp.float32)
    inv_h = 1.0 / y.shape[-1]
    mean = jnp.sum(y, axis=-1, keepdims=True) * inv_h
    mean_sq = jnp.sum(y * y, axis=-1, keepdims=True) * inv_h
    var = jnp.maximum(mean_sq - mean * mean, 0.0)
    inv = jax.lax.rsqrt(var + eps)

    gamma = g_ref[...].astype(jnp.float32)
    beta = beta_ref[...].astype(jnp.float32)
    o_ref[...] = ((y - mean) * (inv * gamma) + beta).astype(o_ref.dtype)


def bert_self_output(hidden_states, input_tensor, w_t, bias, gamma, beta,
                     *, eps=1e-12, tile_m=1024, mxu_dtype=None):
    """Fused BertSelfOutput forward.

    hidden_states, input_tensor: (B, S, H)
    w_t: (H, H) dense weight already transposed to (in, out)  [= torch weight.T]
    bias, gamma, beta: (H,)
    mxu_dtype: dtype fed to the MXU (default: activation dtype).  On v5e this op is
      compute-bound for H>=768, so pass jnp.bfloat16 even for f32 activations; the
      accumulation and LayerNorm stay f32.  NOTE: weights are (down)cast to this dtype.
    """
    B, S, H = hidden_states.shape
    tokens = B * S

    act_dtype = hidden_states.dtype
    if mxu_dtype is None:
        mxu_dtype = act_dtype
    mxu_dtype = jnp.dtype(mxu_dtype)

    x2d = hidden_states.reshape(tokens, H).astype(mxu_dtype)
    r2d = input_tensor.reshape(tokens, H)
    w2d = jnp.asarray(w_t).astype(mxu_dtype)
    b2d = bias.reshape(1, H)
    g2d = gamma.reshape(1, H)
    beta2d = beta.reshape(1, H)

    act_bytes = jnp.dtype(act_dtype).itemsize
    mxu_bytes = mxu_dtype.itemsize

    # Per-generation VMEM budget: leave ~25% headroom for compiler scratch/semaphores.
    # v7x (64 MiB physical) -> ~48 MiB; v5e/v6e (128 MiB) -> ~96 MiB.
    vmem_budget = _vmem_capacity_bytes() * 3 // 4
    tm, vmem_need = _select_tile_m(tokens, H, act_bytes, mxu_bytes, vmem_budget, tile_m)
    n_steps = pl.cdiv(tokens, tm)
    vmem_limit = int(min(vmem_budget, max(32 * 1024 * 1024, int(1.5 * vmem_need))))

    # Advisory cost estimate so XLA can overlap surrounding ops with this kernel.
    cost = pl.CostEstimate(
        flops=2 * tokens * H * H + 10 * tokens * H,
        transcendentals=tokens,  # one rsqrt per row
        bytes_accessed=(tokens * H * (mxu_bytes + 2 * act_bytes)   # x, residual, out
                        + H * H * mxu_bytes + 3 * H * 4),
    )

    # Grid-invariant operands: whole-array VMEM residents (single buffer, never re-fetched).
    resident = pl.BlockSpec(memory_space=pltpu.MemorySpace.VMEM)

    out = pl.pallas_call(
        functools.partial(_self_output_kernel, eps=eps),
        out_shape=jax.ShapeDtypeStruct((tokens, H), act_dtype),
        grid_spec=pltpu.PrefetchScalarGridSpec(
            num_scalar_prefetch=0,
            grid=(n_steps,),
            in_specs=[
                pl.BlockSpec((tm, H), lambda i: (i, 0)),  # hidden_states tile
                pl.BlockSpec((tm, H), lambda i: (i, 0)),  # residual tile
                resident,                                  # dense weight (H, H)
                resident,                                  # dense bias   (1, H)
                resident,                                  # LN gamma     (1, H)
                resident,                                  # LN beta      (1, H)
            ],
            out_specs=pl.BlockSpec((tm, H), lambda i: (i, 0)),
        ),
        compiler_params=pltpu.CompilerParams(
            dimension_semantics=("parallel",),
            vmem_limit_bytes=vmem_limit,
        ),
        cost_estimate=cost,
    )(x2d, r2d, w2d, b2d, g2d, beta2d)

    return out.reshape(B, S, H)


def reference(hidden_states, input_tensor, w_t, bias, gamma, beta, eps=1e-12):
    h = jnp.einsum("bsh,ho->bso", hidden_states, w_t) + bias
    y = h + input_tensor
    mean = jnp.mean(y, axis=-1, keepdims=True)
    var = jnp.mean((y - mean) ** 2, axis=-1, keepdims=True)
    return (y - mean) * jax.lax.rsqrt(var + eps) * gamma + beta


if __name__ == "__main__":
    eps = 1e-12
    key = jax.random.PRNGKey(0)
    k1, k2, k3, k4 = jax.random.split(key, 4)

    H = 256
    # nn.Linear(H, H): weight (out, in) -> pass transposed (in, out); bias (H,)
    w = jax.random.normal(k3, (H, H), dtype=jnp.float32) * (1.0 / jnp.sqrt(H))
    w_t = w.T
    bias = jax.random.normal(k4, (H,), dtype=jnp.float32) * 0.02
    gamma = jnp.ones((H,), dtype=jnp.float32)   # nn.LayerNorm init
    beta = jnp.zeros((H,), dtype=jnp.float32)

    # --- f32 path (strict-ish check): batch=2, seq=8, hidden=256 ---
    B, S = 2, 8
    hs = jax.random.normal(k1, (B, S, H), dtype=jnp.float32)
    res = jax.random.normal(k2, (B, S, H), dtype=jnp.float32)
    out = jax.block_until_ready(bert_self_output(hs, res, w_t, bias, gamma, beta, eps=eps))
    ref = reference(hs, res, w_t, bias, gamma, beta, eps=eps)
    assert out.shape == (B, S, H)
    assert jnp.allclose(out, ref, atol=1e-3, rtol=1e-3), "f32 mismatch vs reference"

    # --- bf16 path with ragged tokens (15): exercises the masked last block,
    #     no host-side pad/slice HBM passes ---
    B2, S2 = 3, 5
    hs16 = jax.random.normal(k1, (B2, S2, H), dtype=jnp.bfloat16)
    res16 = jax.random.normal(k2, (B2, S2, H), dtype=jnp.bfloat16)
    w_t16 = w_t.astype(jnp.bfloat16)
    out16 = jax.block_until_ready(
        bert_self_output(hs16, res16, w_t16, bias, gamma, beta, eps=eps))
    ref16 = reference(hs16.astype(jnp.float32), res16.astype(jnp.float32),
                      w_t16.astype(jnp.float32), bias, gamma, beta, eps=eps)
    assert out16.shape == (B2, S2, H)
    assert jnp.allclose(out16.astype(jnp.float32), ref16, atol=5e-2, rtol=5e-2), \
        "bf16 mismatch vs reference"

    # --- multi-step grid (>=2 steps, feeds v7x dual-TC) + v5e bf16-MXU knob on f32 acts ---
    B3, S3 = 4, 64
    hs3 = jax.random.normal(k1, (B3, S3, H), dtype=jnp.float32)
    res3 = jax.random.normal(k2, (B3, S3, H), dtype=jnp.float32)
    out3 = jax.block_until_ready(
        bert_self_output(hs3, res3, w_t, bias, gamma, beta, eps=eps,
                         tile_m=128, mxu_dtype=jnp.bfloat16))
    ref3 = reference(hs3, res3, w_t, bias, gamma, beta, eps=eps)
    assert out3.shape == (B3, S3, H)
    assert jnp.allclose(out3, ref3, atol=5e-2, rtol=5e-2), "bf16-MXU mismatch vs reference"

    print("KERNEL_OK")
</pallas_src>

<mosaic_0001>
module attributes {stable_mosaic.version = 11 : i64} {
  func.func @_self_output_kernel(%arg0: i32, %arg1: memref<16x256xf32, #tpu.memory_space<vmem>>, %arg2: memref<16x256xf32, #tpu.memory_space<vmem>>, %arg3: memref<256x256xf32, #tpu.memory_space<vmem>>, %arg4: memref<1x256xf32, #tpu.memory_space<vmem>>, %arg5: memref<1x256xf32, #tpu.memory_space<vmem>>, %arg6: memref<1x256xf32, #tpu.memory_space<vmem>>, %arg7: memref<16x256xf32, #tpu.memory_space<vmem>>) attributes {dimension_semantics = [#tpu.dimension_semantics<parallel>], iteration_bounds = array<i64: 1>, scalar_prefetch = 0 : i64, scratch_operands = 0 : i64, tpu.core_type = #tpu.core_type<tc>, window_params = [{transform_indices = @transform_0, window_bounds = array<i64: 16, 256>}, {transform_indices = @transform_1, window_bounds = array<i64: 16, 256>}, {pipeline_mode = #tpu.pipeline_mode<synchronous>, transform_indices = @transform_2, window_bounds = array<i64: 256, 256>}, {pipeline_mode = #tpu.pipeline_mode<synchronous>, transform_indices = @transform_3, window_bounds = array<i64: 1, 256>}, {pipeline_mode = #tpu.pipeline_mode<synchronous>, transform_indices = @transform_4, window_bounds = array<i64: 1, 256>}, {pipeline_mode = #tpu.pipeline_mode<synchronous>, transform_indices = @transform_5, window_bounds = array<i64: 1, 256>}, {transform_indices = @transform_6, window_bounds = array<i64: 16, 256>}]} {
    %c0 = arith.constant 0 : index
    %c0_0 = arith.constant 0 : index
    %0 = vector.load %arg1[%c0, %c0_0] : memref<16x256xf32, #tpu.memory_space<vmem>>, vector<16x256xf32>
    %c0_1 = arith.constant 0 : index
    %c0_2 = arith.constant 0 : index
    %1 = vector.load %arg3[%c0_1, %c0_2] : memref<256x256xf32, #tpu.memory_space<vmem>>, vector<256x256xf32>
    %cst = arith.constant dense<0.000000e+00> : vector<16x256xf32>
    %2 = tpu.matmul %0, %1, %cst {dimension_numbers = #tpu.dot_dimension_numbers<[1], [0], [0], [1], [0, 0, 1, 1], [], []>} : vector<16x256xf32>, vector<256x256xf32>, vector<16x256xf32> -> vector<16x256xf32>
    %c0_3 = arith.constant 0 : index
    %c0_4 = arith.constant 0 : index
    %3 = vector.load %arg4[%c0_3, %c0_4] : memref<1x256xf32, #tpu.memory_space<vmem>>, vector<1x256xf32>
    %4 = vector.broadcast %3 : vector<1x256xf32> to vector<16x256xf32>
    %5 = arith.addf %2, %4 : vector<16x256xf32>
    %c0_5 = arith.constant 0 : index
    %c0_6 = arith.constant 0 : index
    %6 = vector.load %arg2[%c0_5, %c0_6] : memref<16x256xf32, #tpu.memory_space<vmem>>, vector<16x256xf32>
    %7 = arith.addf %5, %6 : vector<16x256xf32>
    %cst_7 = arith.constant dense<0.000000e+00> : vector<16xf32>
    %8 = vector.multi_reduction <add>, %7, %cst_7 [1] : vector<16x256xf32> to vector<16xf32>
    %9 = vector.shape_cast %8 : vector<16xf32> to vector<16x1xf32>
    %cst_8 = arith.constant 3.906250e-03 : f32
    %10 = vector.broadcast %cst_8 : f32 to vector<16x1xf32>
    %11 = arith.mulf %9, %10 : vector<16x1xf32>
    %12 = arith.mulf %7, %7 : vector<16x256xf32>
    %cst_9 = arith.constant dense<0.000000e+00> : vector<16xf32>
    %13 = vector.multi_reduction <add>, %12, %cst_9 [1] : vector<16x256xf32> to vector<16xf32>
    %14 = vector.shape_cast %13 : vector<16xf32> to vector<16x1xf32>
    %cst_10 = arith.constant 3.906250e-03 : f32
    %15 = vector.broadcast %cst_10 : f32 to vector<16x1xf32>
    %16 = arith.mulf %14, %15 : vector<16x1xf32>
    %17 = arith.mulf %11, %11 : vector<16x1xf32>
    %18 = arith.subf %16, %17 : vector<16x1xf32>
    %cst_11 = arith.constant 0.000000e+00 : f32
    %19 = vector.broadcast %cst_11 : f32 to vector<16x1xf32>
    %20 = arith.maximumf %18, %19 : vector<16x1xf32>
    %cst_12 = arith.constant 9.99999996E-13 : f32
    %21 = vector.broadcast %cst_12 : f32 to vector<16x1xf32>
    %22 = arith.addf %20, %21 : vector<16x1xf32>
    %23 = math.rsqrt %22 : vector<16x1xf32>
    %c0_13 = arith.constant 0 : index
    %c0_14 = arith.constant 0 : index
    %24 = vector.load %arg5[%c0_13, %c0_14] : memref<1x256xf32, #tpu.memory_space<vmem>>, vector<1x256xf32>
    %c0_15 = arith.constant 0 : index
    %c0_16 = arith.constant 0 : index
    %25 = vector.load %arg6[%c0_15, %c0_16] : memref<1x256xf32, #tpu.memory_space<vmem>>, vector<1x256xf32>
    %26 = vector.broadcast %11 : vector<16x1xf32> to vector<16x256xf32>
    %27 = arith.subf %7, %26 : vector<16x256xf32>
    %28 = vector.broadcast %23 : vector<16x1xf32> to vector<16x256xf32>
    %29 = vector.broadcast %24 : vector<1x256xf32> to vector<16x256xf32>
    %30 = arith.mulf %28, %29 : vector<16x256xf32>
    %31 = arith.mulf %27, %30 : vector<16x256xf32>
    %32 = vector.broadcast %25 : vector<1x256xf32> to vector<16x256xf32>
    %33 = arith.addf %31, %32 : vector<16x256xf32>
    %c0_17 = arith.constant 0 : index
    %c0_18 = arith.constant 0 : index
    %34 = vector.load %arg7[%c0_17, %c0_18] : memref<16x256xf32, #tpu.memory_space<vmem>>, vector<16x256xf32>
    tpu.vector_store %arg7[%c0_17, %c0_18], %33 {strides = array<i32>} : memref<16x256xf32, #tpu.memory_space<vmem>>, vector<16x256xf32>,
    return
  }
  func.func @transform_0(%arg0: i32) -> (i32, i32) {
    %c0_i32 = arith.constant 0 : i32
    %c0_i32_0 = arith.constant 0 : i32
    return %arg0, %c0_i32 : i32, i32
  }
  func.func @transform_1(%arg0: i32) -> (i32, i32) {
    %c0_i32 = arith.constant 0 : i32
    %c0_i32_0 = arith.constant 0 : i32
    return %arg0, %c0_i32 : i32, i32
  }
  func.func @transform_2(%arg0: i32) -> (i32, i32) {
    %c0_i32 = arith.constant 0 : i32
    %c0_i32_0 = arith.constant 0 : i32
    %c0_i32_1 = arith.constant 0 : i32
    return %c0_i32, %c0_i32_0 : i32, i32
  }
  func.func @transform_3(%arg0: i32) -> (i32, i32) {
    %c0_i32 = arith.constant 0 : i32
    %c0_i32_0 = arith.constant 0 : i32
    %c0_i32_1 = arith.constant 0 : i32
    return %c0_i32, %c0_i32_0 : i32, i32
  }
  func.func @transform_4(%arg0: i32) -> (i32, i32) {
    %c0_i32 = arith.constant 0 : i32
    %c0_i32_0 = arith.constant 0 : i32
    %c0_i32_1 = arith.constant 0 : i32
    return %c0_i32, %c0_i32_0 : i32, i32
  }
  func.func @transform_5(%arg0: i32) -> (i32, i32) {
    %c0_i32 = arith.constant 0 : i32
    %c0_i32_0 = arith.constant 0 : i32
    %c0_i32_1 = arith.constant 0 : i32
    return %c0_i32, %c0_i32_0 : i32, i32
  }
  func.func @transform_6(%arg0: i32) -> (i32, i32) {
    %c0_i32 = arith.constant 0 : i32
    %c0_i32_0 = arith.constant 0 : i32
    return %arg0, %c0_i32 : i32, i32
  }
}

</mosaic_0001>

<bundles_post_ra>
// kernel: tpu_custom_call.1
= control target key start
LH: loop header
LB: loop body
LE: loop exit
PB: predicated region body
PF: predicated region fallthrough
CT: control target
= control target key end

     0   :  { %11 = vsyncpa [#allocation3], 0  ;;  %s598_s0 = inlined_call_operand.hbm [shape: f32[16,256], index: 0, kind: input, shape index: {}]   ;;  %s599_s1 = inlined_call_operand.hbm [shape: f32[16,256], index: 1, kind: input, shape index: {}]   ;;  %s600_s2 = inlined_call_operand.hbm [shape: f32[256,256], index: 2, kind: input, shape index: {}]   ;;  %s601_s3 = inlined_call_operand.vmem [shape: f32[1,256], index: 3, kind: input, shape index: {}]   ;;  %s602_s4 = inlined_call_operand.hbm [shape: f32[1,256], index: 4, kind: input, shape index: {}]   ;;  %s603_s5 = inlined_call_operand.vmem [shape: f32[1,256], index: 5, kind: input, shape index: {}]   ;;  %s604_s6 = inlined_call_operand.hbm [shape: f32[16,256], index: 6, kind: output, shape index: {}]  }
   0x1   :  { %12 = vsyncpa [#allocation6], 0 }
   0x2   :  { %13 = vsyncpa [#allocation9], 0 }
   0x3   :  { %14 = vsyncpa [#allocation4], 0  ;;  %s32_s23 = sshll.u32 %s599_s1, 4  ;;  %s499_s24 = smov [#allocation5]   ;;  %s33_s23 = int_to_ptr.hbm [resolvable:$true] %s32_s23 }
   0x4   :  { %s34_s25 = sshll.u32 %s499_s24, 4  ;;  %s19_s28 = sshll.u32 %s598_s0, 4  ;;  %s35_s25 = int_to_ptr.vmem [resolvable:$true] %s34_s25  ;;  %s20_s28 = int_to_ptr.hbm [resolvable:$true] %s19_s28 }
   0x5   :  { %s500_s29 = smov 256   ;;  %s501_s30 = smov 16  }
   0x6   :  { %40 = dma.hbm_to_vmem [thread:$0]  %s33_s23, 512, %s35_s25, [#allocation6], %s500_s29, %s500_s29, %s501_s30  }
   0x7   :  { %s502_s7 = smov [#allocation2]   ;;  %s45_s1 = sshll.u32 %s600_s2, 4  ;;  %s46_s1 = int_to_ptr.hbm [resolvable:$true] %s45_s1 }
   0x8   :  { %s21_s8 = sshll.u32 %s502_s7, 4  ;;  %s61_s12 = sshll.u32 %s602_s4, 4  ;;  %s22_s8 = int_to_ptr.vmem [resolvable:$true] %s21_s8  ;;  %s62_s12 = int_to_ptr.hbm [resolvable:$true] %s61_s12 }
   0x9   :  { %27 = dma.hbm_to_vmem [thread:$0]  %s20_s28, 512, %s22_s8, [#allocation3], %s500_s29, %s500_s29, %s501_s30  }
   0xa   :  { %s503_s13 = smov [#allocation7]   ;;  %s504_s15 = smov [#allocation8]  }
   0xb   :  { %s47_s14 = sshll.u32 %s503_s13, 4  ;;  %s63_s2 = sshll.u32 %s504_s15, 4  ;;  %s48_s14 = int_to_ptr.vmem [resolvable:$true] %s47_s14  ;;  %s64_s2 = int_to_ptr.vmem [resolvable:$true] %s63_s2 }
   0xc   :  { %53 = dma.hbm_to_vmem [thread:$0]  %s46_s1, 8192, %s48_s14, [#allocation6], %s500_s29, %s500_s29, %s501_s30  }
   0xd   :  { %66 = dma.hbm_to_vmem [thread:$0]  %s62_s12, 32, %s64_s2, [#allocation9]  }
   0xe   :  { %491 = dma.done.wait [#allocation3], 512  }
   0xf   :  { %492 = vsyncadd [#allocation3], 4294966784 }
  0x10   :  { %493 = dma.done.wait [#allocation6], 8704  }
  0x11   :  { %494 = vsyncadd [#allocation6], 4294958592 }
  0x12   :  { %495 = dma.done.wait [#allocation9], 32  }
  0x13   :  { %496 = vsyncadd [#allocation9], 4294967264  ;;  %v120_v0 = vld [vmem:[#allocation7 + $0xf8] sm:$0xff]  ;;  %v118_v1 = vld [vmem:[#allocation7 + $0xe8] sm:$0xff]  ;;  %s345_s21 = sshll.u32 %s604_s6, 4  ;;  %s346_s21 = int_to_ptr.hbm [resolvable:$true] %s345_s21 }
  0x14   :  { %v152_v2 = vld [vmem:[#allocation7 + $0x1f8] sm:$0xff]  ;;  %205 = vmatpush.msra.mxu2 %v120_v0  ;;  %v150_v3 = vld [vmem:[#allocation7 + $0x1e8] sm:$0xff]  ;;  %v119_v4 = vld [vmem:[#allocation7 + $0xf0] sm:$0xff] }
  0x15   :  { %228 = vmatpush.msra.mxu3 %v152_v2  ;;  %v116_v5 = vld [vmem:[#allocation7 + $0xd8] sm:$0xff]  ;;  %159 = vmatpush.msra.mxu0 %v119_v4  ;;  %v117_v7 = vld [vmem:[#allocation7 + $0xe0] sm:$0xff]  ;;  %v114_v8 = vld [vmem:[#allocation7 + $0xc8] sm:$0xff] }
  0x16   :  { %v148_v6 = vld [vmem:[#allocation7 + $0x1d8] sm:$0xff]  ;;  %206 = vmatpush.msra.mxu2 %v118_v1  ;;  %v151_v9 = vld [vmem:[#allocation7 + $0x1f0] sm:$0xff]  ;;  %v146_v10 = vld [vmem:[#allocation7 + $0x1c8] sm:$0xff] }
  0x17   :  { %229 = vmatpush.msra.mxu3 %v150_v3  ;;  %160 = vmatpush.msra.mxu0 %v117_v7  ;;  %v115_v11 = vld [vmem:[#allocation7 + $0xd0] sm:$0xff]  ;;  %v149_v12 = vld [vmem:[#allocation7 + $0x1e0] sm:$0xff]  ;;  %v112_v15 = vld [vmem:[#allocation7 + $0xb8] sm:$0xff] }
  0x18   :  { %182 = vmatpush.msra.mxu1 %v151_v9  ;;  %207 = vmatpush.msra.mxu2 %v116_v5  ;;  %v113_v13 = vld [vmem:[#allocation7 + $0xc0] sm:$0xff]  ;;  %v147_v14 = vld [vmem:[#allocation7 + $0x1d0] sm:$0xff]  ;;  %v144_v16 = vld [vmem:[#allocation7 + $0x1b8] sm:$0xff] }
  0x19   :  { %230 = vmatpush.msra.mxu3 %v148_v6  ;;  %161 = vmatpush.msra.mxu0 %v115_v11  ;;  %v111_v17 = vld [vmem:[#allocation7 + $0xb0] sm:$0xff]  ;;  %v145_v18 = vld [vmem:[#allocation7 + $0x1c0] sm:$0xff]  ;;  %v110_v19 = vld [vmem:[#allocation7 + $0xa8] sm:$0xff] }
  0x1a   :  { %183 = vmatpush.msra.mxu1 %v149_v12  ;;  %208 = vmatpush.msra.mxu2 %v114_v8  ;;  %v142_v20 = vld [vmem:[#allocation7 + $0x1a8] sm:$0xff]  ;;  %v109_v21 = vld [vmem:[#allocation7 + $0xa0] sm:$0xff]  ;;  %v143_v22 = vld [vmem:[#allocation7 + $0x1b0] sm:$0xff] }
  0x1b   :  { %231 = vmatpush.msra.mxu3 %v146_v10  ;;  %162 = vmatpush.msra.mxu0 %v113_v13  ;;  %v108_v23 = vld [vmem:[#allocation7 + $0x98] sm:$0xff]  ;;  %v107_v25 = vld [vmem:[#allocation7 + $0x90] sm:$0xff]  ;;  %v141_v26 = vld [vmem:[#allocation7 + $0x1a0] sm:$0xff] }
  0x1c   :  { %184 = vmatpush.msra.mxu1 %v147_v14  ;;  %209 = vmatpush.msra.mxu2 %v112_v15  ;;  %v140_v24 = vld [vmem:[#allocation7 + $0x198] sm:$0xff]  ;;  %v106_v27 = vld [vmem:[#allocation7 + $0x88] sm:$0xff]  ;;  %v105_v29 = vld [vmem:[#allocation7 + $0x80] sm:$0xff] }
  0x1d   :  { %232 = vmatpush.msra.mxu3 %v144_v16  ;;  %163 = vmatpush.msra.mxu0 %v111_v17  ;;  %v138_v28 = vld [vmem:[#allocation7 + $0x188] sm:$0xff]  ;;  %v139_v30 = vld [vmem:[#allocation7 + $0x190] sm:$0xff]  ;;  %v104_v31 = vld [vmem:[#allocation7 + $0x78] sm:$0xff] }
  0x1e   :  { %185 = vmatpush.msra.mxu1 %v145_v18  ;;  %210 = vmatpush.msra.mxu2 %v110_v19  ;;  %v136_v32 = vld [vmem:[#allocation7 + $0x178] sm:$0xff]  ;;  %v103_v33 = vld [vmem:[#allocation7 + $0x70] sm:$0xff]  ;;  %v137_v34 = vld [vmem:[#allocation7 + $0x180] sm:$0xff] }
  0x1f   :  { %233 = vmatpush.msra.mxu3 %v142_v20  ;;  %164 = vmatpush.msra.mxu0 %v109_v21  ;;  %v102_v35 = vld [vmem:[#allocation7 + $0x68] sm:$0xff]  ;;  %v101_v37 = vld [vmem:[#allocation7 + $0x60] sm:$0xff]  ;;  %v135_v38 = vld [vmem:[#allocation7 + $0x170] sm:$0xff] }
  0x20   :  { %186 = vmatpush.msra.mxu1 %v143_v22  ;;  %211 = vmatpush.msra.mxu2 %v108_v23  ;;  %v134_v36 = vld [vmem:[#allocation7 + $0x168] sm:$0xff]  ;;  %v100_v39 = vld [vmem:[#allocation7 + $0x58] sm:$0xff]  ;;  %v99_v41 = vld [vmem:[#allocation7 + $0x50] sm:$0xff] }
  0x21   :  { %234 = vmatpush.msra.mxu3 %v140_v24  ;;  %165 = vmatpush.msra.mxu0 %v107_v25  ;;  %v132_v40 = vld [vmem:[#allocation7 + $0x158] sm:$0xff]  ;;  %v133_v42 = vld [vmem:[#allocation7 + $0x160] sm:$0xff]  ;;  %v98_v43 = vld [vmem:[#allocation7 + $0x48] sm:$0xff] }
  0x22   :  { %187 = vmatpush.msra.mxu1 %v141_v26  ;;  %212 = vmatpush.msra.mxu2 %v106_v27  ;;  %v130_v44 = vld [vmem:[#allocation7 + $0x148] sm:$0xff]  ;;  %v97_v45 = vld [vmem:[#allocation7 + $0x40] sm:$0xff]  ;;  %v131_v46 = vld [vmem:[#allocation7 + $0x150] sm:$0xff] }
  0x23   :  { %235 = vmatpush.msra.mxu3 %v138_v28  ;;  %166 = vmatpush.msra.mxu0 %v105_v29  ;;  %v96_v47 = vld [vmem:[#allocation7 + $0x38] sm:$0xff]  ;;  %v95_v49 = vld [vmem:[#allocation7 + $0x30] sm:$0xff]  ;;  %v129_v50 = vld [vmem:[#allocation7 + $0x140] sm:$0xff] }
  0x24   :  { %188 = vmatpush.msra.mxu1 %v139_v30  ;;  %213 = vmatpush.msra.mxu2 %v104_v31  ;;  %v128_v48 = vld [vmem:[#allocation7 + $0x138] sm:$0xff]  ;;  %v94_v51 = vld [vmem:[#allocation7 + $0x28] sm:$0xff]  ;;  %v93_v53 = vld [vmem:[#allocation7 + $0x20] sm:$0xff] }
  0x25   :  { %236 = vmatpush.msra.mxu3 %v136_v32  ;;  %167 = vmatpush.msra.mxu0 %v103_v33  ;;  %v126_v52 = vld [vmem:[#allocation7 + $0x128] sm:$0xff]  ;;  %v127_v54 = vld [vmem:[#allocation7 + $0x130] sm:$0xff]  ;;  %v92_v55 = vld [vmem:[#allocation7 + $0x18] sm:$0xff] }
  0x26   :  { %189 = vmatpush.msra.mxu1 %v137_v34  ;;  %214 = vmatpush.msra.mxu2 %v102_v35  ;;  %v124_v56 = vld [vmem:[#allocation7 + $0x118] sm:$0xff]  ;;  %v91_v57 = vld [vmem:[#allocation7 + $0x10] sm:$0xff]  ;;  %v125_v58 = vld [vmem:[#allocation7 + $0x120] sm:$0xff] }
  0x27   :  { %237 = vmatpush.msra.mxu3 %v134_v36  ;;  %168 = vmatpush.msra.mxu0 %v101_v37  ;;  %v90_v59 = vld [vmem:[#allocation7 + $0x8] sm:$0xff]  ;;  %v85_v61 = vld [vmem:[#allocation2] sm:$0xff]  ;;  %v123_v0 = vld [vmem:[#allocation7 + $0x110] sm:$0xff] }
  0x28   :  { %190 = vmatpush.msra.mxu1 %v135_v38  ;;  %215 = vmatpush.msra.mxu2 %v100_v39  ;;  %v122_v60 = vld [vmem:[#allocation7 + $0x108] sm:$0xff]  ;;  %v89_v63 = vld [vmem:[#allocation7] sm:$0xff]  ;;  %v87_v2 = vld [vmem:[#allocation2 + $0x10] sm:$0xff] }
  0x29   :  { %238 = vmatpush.msra.mxu3 %v132_v40  ;;  %169 = vmatpush.msra.mxu0 %v99_v41  ;;  %v86_v62 = vld [vmem:[#allocation2 + $0x8] sm:$0xff]  ;;  %v121_v1 = vld [vmem:[#allocation7 + $0x100] sm:$0xff]  ;;  %v88_v3 = vld [vmem:[#allocation2 + $0x18] sm:$0xff] }
  0x2a   :  { %191 = vmatpush.msra.mxu1 %v133_v42  ;;  %216 = vmatpush.msra.mxu2 %v98_v43  ;;  %v153_v4 = vld [vmem:[%s601_s3] sm:$0x3]  ;;  %v252_v16 = vld [vmem:[#allocation5 + $0x8] sm:$0xff]  ;;  %v253_v23 = vld [vmem:[#allocation5 + $0x10] sm:$0xff] }
  0x2b   :  { %239 = vmatpush.msra.mxu3 %v130_v44  ;;  %170 = vmatpush.msra.mxu0 %v97_v45  ;;  %v155_v5 = vperm.slane %v153_v4, 0  ;;  %v156_v8 = vperm.slane %v153_v4, 1  ;;  %v251_v10 = vld [vmem:[#allocation5] sm:$0xff]  ;;  %v254_v32 = vld [vmem:[#allocation5 + $0x18] sm:$0xff] }
  0x2c   :  { %192 = vmatpush.msra.mxu1 %v131_v46  ;;  %217 = vmatpush.msra.mxu2 %v96_v47 }
  0x2d   :  { %240 = vmatpush.msra.mxu3 %v128_v48  ;;  %171 = vmatpush.msra.mxu0 %v95_v49 }
  0x2e   :  { %193 = vmatpush.msra.mxu1 %v129_v50  ;;  %218 = vmatpush.msra.mxu2 %v94_v51 }
  0x2f   :  { %241 = vmatpush.msra.mxu3 %v126_v52  ;;  %172 = vmatpush.msra.mxu0 %v93_v53 }
  0x30   :  { %194 = vmatpush.msra.mxu1 %v127_v54  ;;  %219 = vmatpush.msra.mxu2 %v92_v55 }
  0x31   :  { %242 = vmatpush.msra.mxu3 %v124_v56  ;;  %173 = vmatpush.msra.mxu0 %v91_v57 }
  0x32   :  { %195 = vmatpush.msra.mxu1 %v125_v58  ;;  %220 = vmatpush.msra.mxu2 %v90_v59  ;;  %v307_v58 = vld [vmem:[#allocation8] sm:$0x3] }
  0x33   :  { %243 = vmatpush.msra.mxu3 %v122_v60  ;;  %221 = vmatmul.f32.vlgmr.msra.gmra.mxu2 %v85_v61 }
  0x34   :  { %244 = vmatmul.f32.vlgmr.msra.gmra.mxu3 %v86_v62  ;;  %174 = vmatpush.msra.mxu0 %v89_v63  ;;  %v308_v63 = vld [vmem:[%s603_s5] sm:$0x3]  ;;  %s505_s5 = smov [#allocation10]  }
  0x35   :  { %196 = vmatpush.msra.mxu1 %v123_v0  ;;  %175 = vmatmul.f32.vlgmr.msra.gmra.mxu0 %v85_v61  ;;  %v314_v61 = vperm.slane %v307_v58, 0  ;;  %s343_s18 = sshll.u32 %s505_s5, 4  ;;  %s344_s18 = int_to_ptr.vmem [resolvable:$true] %s343_s18 }
  0x37   :  { %197 = vmatpush.msra.mxu1 %v121_v1 }
  0x38   :  { %198 = vmatmul.f32.vlgmr.msra.gmra.mxu1 %v86_v62  ;;  %v315_v62 = vperm.slane %v307_v58, 1 }
  0x3b   :  { %224 = vmatmul.f32.gmra.mxu2 %v87_v2 }
  0x3c   :  { %247 = vmatmul.f32.gmra.mxu3 %v88_v3 }
  0x3d   :  { %178 = vmatmul.f32.gmra.mxu0 %v87_v2 }
  0x40   :  { %201 = vmatmul.f32.gmra.mxu1 %v88_v3 }
  0xb2   :  { %v176_v6 = vpop.f32.mrf.mxu0 }
  0xb3   :  { %v177_v7 = vadd.f32 %v176_v6, %v155_v5  ;;  %v328_v6 = vperm.slane %v308_v63, 1 }
  0xb5   :  { %v199_v9 = vpop.f32.mrf.mxu1 }
  0xb6   :  { %v200_v11 = vadd.f32 %v199_v9, %v177_v7  ;;  %v222_v12 = vpop.f32.mrf.mxu2 }
  0xb7   :  { %v245_v13 = vpop.f32.mrf.mxu3  ;;  %v223_v14 = vadd.f32 %v222_v12, %v156_v8 }
  0xb8   :  { %v565_v15 = vadd.f32 %v251_v10, %v200_v11 }
  0xb9   :  { %v246_v17 = vadd.f32 %v245_v13, %v223_v14 }
  0xba   :  { %v179_v18 = vpop.f32.mrf.mxu0  ;;  %v267_v21 = vmul.f32 %v565_v15, %v565_v15 }
  0xbb   :  { %v567_v19 = vadd.f32 %v252_v16, %v246_v17  ;;  %v180_v20 = vadd.f32 %v179_v18, %v155_v5  ;;  %v327_v5 = vperm.slane %v308_v63, 0 }
  0xbd   :  { %v202_v22 = vpop.f32.mrf.mxu1  ;;  %v259_v24 = vadd.f32 %v567_v19, %v565_v15  ;;  %v268_v26 = vmul.f32 %v567_v19, %v567_v19 }
  0xbe   :  { %v203_v25 = vadd.f32 %v202_v22, %v180_v20  ;;  %v225_v27 = vpop.f32.mrf.mxu2 }
  0xbf   :  { %v248_v28 = vpop.f32.mrf.mxu3  ;;  %v226_v29 = vadd.f32 %v225_v27, %v156_v8  ;;  %260 = vadd.xlane.f32.xlu0 %v259_v24  ;;  %v271_v31 = vadd.f32 %v268_v26, %v267_v21 }
  0xc0   :  { %v575_v30 = vadd.f32 %v253_v23, %v203_v25 }
  0xc1   :  { %v249_v33 = vadd.f32 %v248_v28, %v226_v29  ;;  %272 = vadd.xlane.f32.xlu1 %v271_v31 }
  0xc2   :  { %v269_v35 = vmul.f32 %v575_v30, %v575_v30 }
  0xc3   :  { %v577_v34 = vadd.f32 %v254_v32, %v249_v33 }
  0xc5   :  { %v262_v36 = vadd.f32 %v577_v34, %v575_v30  ;;  %v270_v37 = vmul.f32 %v577_v34, %v577_v34 }
  0xc7   :  { %263 = vadd.xlane.f32.xlu0 %v262_v36  ;;  %v274_v38 = vadd.f32 %v270_v37, %v269_v35 }
  0xc9   :  { %275 = vadd.xlane.f32.xlu1 %v274_v38 }
 0x132   :  { %v261_v39 = vpop.xlane.xlu0 %260 }
 0x133   :  { %v265_v40 = vmul.f32 0.00390625, %v261_v39 }
 0x134   :  { %v273_v41 = vpop.xlane.xlu1 %272 }
 0x135   :  { %v277_v42 = vmul.f32 0.00390625, %v273_v41  ;;  %v279_v43 = vmul.f32 %v265_v40, %v265_v40  ;;  %v309_v3 = vsub.f32 %v565_v15, %v265_v40  ;;  %v310_v7 = vsub.f32 %v567_v19, %v265_v40 }
 0x137   :  { %v281_v44 = vsub.f32 %v277_v42, %v279_v43 }
 0x139   :  { %v283_v45 = vmax.f32 %v281_v44, 0.0 }
 0x13a   :  { %v264_v46 = vpop.xlane.xlu0 %263 }
 0x13b   :  { %v285_v47 = vadd.f32 1e-12, %v283_v45  ;;  %v266_v48 = vmul.f32 0.00390625, %v264_v46 }
 0x13c   :  { %v276_v49 = vpop.xlane.xlu1 %275 }
 0x13d   :  { %367 = vrsqrt.f32 %v285_v47  ;;  %v278_v50 = vmul.f32 0.00390625, %v276_v49  ;;  %v280_v51 = vmul.f32 %v266_v48, %v266_v48  ;;  %vm293_vm1 = vweird.f32 %v285_v47 }
 0x13e   :  { %v311_v20 = vsub.f32 %v575_v30, %v266_v48  ;;  %v312_v19 = vsub.f32 %v577_v34, %v266_v48 }
 0x13f   :  { %v282_v52 = vsub.f32 %v278_v50, %v280_v51 }
 0x141   :  { %v284_v53 = vmax.f32 %v282_v52, 0.0 }
 0x143   :  { %v368_v54 = vpop.eup %367  ;;  %v286_v56 = vadd.f32 1e-12, %v284_v53 }
 0x144   :  { %v288_v55 = vmul.f32 %v368_v54, %v285_v47  ;;  %vm294_vm0 = vweird.f32 %v368_v54 }
 0x145   :  { %369 = vrsqrt.f32 %v286_v56  ;;  %vm295_vm2 = vmor %vm293_vm1, %vm294_vm0  ;;  %vm303_vm4 = vweird.f32 %v286_v56 }
 0x146   :  { %v289_v57 = vmul.f32 %v368_v54, %v288_v55 }
 0x148   :  { %v290_v59 = vmul.f32 0.5, %v289_v57 }
 0x14a   :  { %v291_v60 = vsub.f32 1.5, %v290_v59 }
 0x14b   :  { %v370_v0 = vpop.eup %369 }
 0x14c   :  { %v292_v1 = vmul.f32 %v368_v54, %v291_v60  ;;  %v298_v2 = vmul.f32 %v370_v0, %v286_v56  ;;  %vm304_vm3 = vweird.f32 %v370_v0 }
 0x14d   :  { %vm305_vm5 = vmor %vm303_vm4, %vm304_vm3 }
 0x14e   :  { %v296_v4 = vsel %vm295_vm2, %v368_v54, %v292_v1  ;;  %v299_v10 = vmul.f32 %v370_v0, %v298_v2 }
 0x14f   :  { %v318_v8 = vmul.f32 %v314_v61, %v296_v4  ;;  %v319_v9 = vmul.f32 %v315_v62, %v296_v4 }
 0x150   :  { %v300_v13 = vmul.f32 0.5, %v299_v10 }
 0x151   :  { %v322_v11 = vmul.f32 %v318_v8, %v309_v3  ;;  %v323_v12 = vmul.f32 %v319_v9, %v310_v7 }
 0x152   :  { %v301_v14 = vsub.f32 1.5, %v300_v13 }
 0x153   :  { %v331_v16 = vadd.f32 %v327_v5, %v322_v11  ;;  %v332_v17 = vadd.f32 %v328_v6, %v323_v12 }
 0x154   :  { %v302_v18 = vmul.f32 %v370_v0, %v301_v14 }
 0x155   :  { %335 = vst [vmem:[#allocation10] sm:$0xff] %v331_v16 }
 0x156   :  { %336 = vst [vmem:[#allocation10 + $0x8] sm:$0xff] %v332_v17  ;;  %v306_v15 = vsel %vm305_vm5, %v370_v0, %v302_v18 }
 0x157   :  { %v320_v21 = vmul.f32 %v314_v61, %v306_v15  ;;  %v321_v22 = vmul.f32 %v315_v62, %v306_v15 }
 0x159   :  { %v324_v23 = vmul.f32 %v320_v21, %v311_v20  ;;  %v325_v24 = vmul.f32 %v321_v22, %v312_v19 }
 0x15b   :  { %v333_v25 = vadd.f32 %v327_v5, %v324_v23  ;;  %v334_v26 = vadd.f32 %v328_v6, %v325_v24 }
 0x15d   :  { %337 = vst [vmem:[#allocation10 + $0x10] sm:$0xff] %v333_v25 }
 0x15e   :  { %338 = vst [vmem:[#allocation10 + $0x18] sm:$0xff] %v334_v26 }
 0x15f   :  { %351 = dma.vmem_to_hbm [thread:$0]  %s344_s18, 512, %s346_s21, [#allocation4], %s500_s29, %s500_s29, %s501_s30  }
 0x160   :  { %497 = dma.done.wait [#allocation4], 512  }
 0x161   :  { %498 = vsyncadd [#allocation4], 4294966784 }
 0x162   :  { %356 = vsyncpa [#allocation3], 1 }
 0x163   :  { %357 = vsyncpa [#allocation6], 1 }
 0x164   :  { %358 = vsyncpa [#allocation9], 1 }
 0x165   :  { %359 = vsyncpa [#allocation4], 1 }

</bundles_post_ra>
